<compile_context>
chip_gen: v7x
topology: tpu7x:2x2x1
jax: 0.10.0
libtpu: 0.0.40
codegen_flags: <defaults>
</compile_context>

<pallas_src>
import functools

import jax
import jax.numpy as jnp
from jax.experimental import pallas as pl
from jax.experimental.pallas import tpu as pltpu

NEG_SLOPE = 0.01  # torch.nn.functional.leaky_relu default


def _leaky_relu(x):
    return jnp.where(x > 0, x, NEG_SLOPE * x)


def _round_up(n, m):
    return ((n + m - 1) // m) * m


def nn_pi_kernel(x_ref, w1_ref, b1_ref, w2_ref, b2_ref, w3_ref, b3_ref, o_ref):
    """Feature-major batch tile: Linear -> leaky_relu -> Linear -> leaky_relu -> Linear -> softmax.

    Layout: x_ref is (in, tile_b), o_ref is (out, tile_b); the batch is on the lane axis.
    """
    x = x_ref[...]
    h = jnp.dot(w1_ref[...], x, preferred_element_type=jnp.float32) + b1_ref[...]
    h = _leaky_relu(h)
    h = jnp.dot(w2_ref[...], h, preferred_element_type=jnp.float32) + b2_ref[...]
    h = _leaky_relu(h)
    logits = jnp.dot(w3_ref[...], h, preferred_element_type=jnp.float32) + b3_ref[...]

    # softmax over the feature (sublane) axis; batch columns are independent.
    m = jnp.max(logits, axis=0, keepdims=True)          # (1, tile_b)
    e = jnp.exp(logits - m)
    denom = jnp.sum(e, axis=0, keepdims=True)           # (1, tile_b)
    o_ref[...] = (e / denom).astype(o_ref.dtype)        # exact divide (review note)


def init_nn_pi_params(key, in_size, out_size, layers):
    """PyTorch-style nn.Linear init U(-k, k), k = 1/sqrt(fan_in).

    Weights stay in native (fan_out, fan_in) order; biases are stored as (fan_out, 1)
    columns so they broadcast along the lane (batch) axis with zero per-call glue.
    """
    sizes = [in_size] + list(layers) + [out_size]
    params = []
    for i in range(len(sizes) - 1):
        fan_in, fan_out = sizes[i], sizes[i + 1]
        key, kw, kb = jax.random.split(key, 3)
        bound = 1.0 / (float(fan_in) ** 0.5)
        w = jax.random.uniform(kw, (fan_out, fan_in), jnp.float32, -bound, bound)
        b = jax.random.uniform(kb, (fan_out,), jnp.float32, -bound, bound)
        params.append((w, b[:, None]))
    return params


@functools.partial(jax.jit, static_argnames=("tile_b",))
def nn_pi_forward(x, params, tile_b=8192):
    """x: (batch, in_size) float32 -> action probabilities (batch, out_size)."""
    (w1, b1), (w2, b2), (w3, b3) = params
    batch, in_size = x.shape
    out_size = w3.shape[0]

    # Feature-major stream: batch on the 128-lane axis. (In a real RL pipeline the
    # caller would keep observations feature-major to avoid this transpose.)
    x_t = x.T  # (in_size, batch)

    # Static tile selection:
    #  * default 8192 columns (~0.25 MiB x-slab, ~0.13 MiB out-slab, ~3 MiB of
    #    intermediates) amortizes per-step overhead and is far below VMEM limits,
    #  * cap so big batches keep >=2 grid steps for v7x's 2 TensorCores,
    #  * a batch that fits one tile runs as a single full-extent block (no padding,
    #    and the block-shape == array-shape exemption covers tiny/odd batches).
    tile = tile_b
    if batch > 256:
        tile = min(tile, _round_up(pl.cdiv(batch, 2), 128))
    if tile >= batch:
        tile = batch
    else:
        tile = _round_up(tile, 128)
    grid = (pl.cdiv(batch, tile),)
    # No jnp.pad: the partial last block's writeback is masked by Pallas and the
    # garbage tail columns never interact across the per-column softmax.

    def resident(arr):
        # Constant index_map -> block index never changes, so the pipeline does not
        # re-issue the DMA after step 0; weights/biases stay VMEM-resident.
        return pl.BlockSpec(arr.shape, lambda i: (0, 0))

    out_t = pl.pallas_call(
        nn_pi_kernel,
        out_shape=jax.ShapeDtypeStruct((out_size, batch), jnp.float32),
        grid=grid,
        in_specs=[
            pl.BlockSpec((in_size, tile), lambda i: (0, i)),
            resident(w1), resident(b1),
            resident(w2), resident(b2),
            resident(w3), resident(b3),
        ],
        out_specs=pl.BlockSpec((out_size, tile), lambda i: (0, i)),
        compiler_params=pltpu.CompilerParams(
            # batch axis is embarrassingly parallel -> shards across v7x's 2 TCs
            dimension_semantics=("parallel",),
        ),
    )(x_t, w1, b1, w2, b2, w3, b3)
    return out_t.T  # back to (batch, out_size)


def nn_pi_reference(x, params):
    """Pure-JAX reference of the PyTorch forward (native (fan_out, fan_in) weights)."""
    (w1, b1), (w2, b2), (w3, b3) = params
    h = _leaky_relu(x @ w1.T + b1[:, 0])
    h = _leaky_relu(h @ w2.T + b2[:, 0])
    logits = h @ w3.T + b3[:, 0]
    return jax.nn.softmax(logits, axis=-1)


if __name__ == "__main__":
    # LunarLander-style sizes: obs dim 8, 4 discrete actions, hidden layers [32, 32].
    in_size, out_size = 8, 4
    hidden = [32, 32]

    key = jax.random.PRNGKey(0)
    key_p, key_x1, key_x2 = jax.random.split(key, 3)
    params = init_nn_pi_params(key_p, in_size, out_size, hidden)

    # Exact softmax divide now; tolerance only covers matmul accumulation-order /
    # MXU precision differences vs the XLA reference.
    ATOL = 1e-3

    # 1) Tiny online-RL batch: single full-extent block, no padding, no masked work.
    x_small = jax.random.normal(key_x1, (4, in_size), jnp.float32)
    out_small = jax.block_until_ready(nn_pi_forward(x_small, params))
    ref_small = nn_pi_reference(x_small, params)
    assert out_small.shape == (4, out_size)
    assert jnp.allclose(out_small, ref_small, atol=ATOL, rtol=1e-3), "mismatch (small batch)"
    assert jnp.allclose(jnp.sum(out_small, axis=-1), 1.0, atol=1e-5), "rows must sum to 1"

    # 2) Misaligned larger batch exercising the tiled path: 2 grid steps with a
    #    masked partial last block (600 rows, 384-wide tiles).
    x_big = jax.random.normal(key_x2, (600, in_size), jnp.float32)
    out_big = jax.block_until_ready(nn_pi_forward(x_big, params))
    ref_big = nn_pi_reference(x_big, params)
    assert out_big.shape == (600, out_size)
    assert jnp.allclose(out_big, ref_big, atol=ATOL, rtol=1e-3), "mismatch (tiled batch)"
    assert jnp.allclose(jnp.sum(out_big, axis=-1), 1.0, atol=1e-5), "rows must sum to 1"

    print("KERNEL_OK")
</pallas_src>

<mosaic_0001>
module attributes {stable_mosaic.version = 11 : i64} {
  func.func @nn_pi_kernel(%arg0: i32, %arg1: memref<8x4xf32, #tpu.memory_space<vmem>>, %arg2: memref<32x8xf32, #tpu.memory_space<vmem>>, %arg3: memref<32x1xf32, #tpu.memory_space<vmem>>, %arg4: memref<32x32xf32, #tpu.memory_space<vmem>>, %arg5: memref<32x1xf32, #tpu.memory_space<vmem>>, %arg6: memref<4x32xf32, #tpu.memory_space<vmem>>, %arg7: memref<4x1xf32, #tpu.memory_space<vmem>>, %arg8: memref<4x4xf32, #tpu.memory_space<vmem>>) attributes {dimension_semantics = [#tpu.dimension_semantics<parallel>], iteration_bounds = array<i64: 1>, scalar_prefetch = 0 : i64, scratch_operands = 0 : i64, tpu.core_type = #tpu.core_type<tc>, window_params = [{transform_indices = @transform_0, window_bounds = array<i64: 8, 4>}, {pipeline_mode = #tpu.pipeline_mode<synchronous>, transform_indices = @transform_1, window_bounds = array<i64: 32, 8>}, {pipeline_mode = #tpu.pipeline_mode<synchronous>, transform_indices = @transform_2, window_bounds = array<i64: 32, 1>}, {pipeline_mode = #tpu.pipeline_mode<synchronous>, transform_indices = @transform_3, window_bounds = array<i64: 32, 32>}, {pipeline_mode = #tpu.pipeline_mode<synchronous>, transform_indices = @transform_4, window_bounds = array<i64: 32, 1>}, {pipeline_mode = #tpu.pipeline_mode<synchronous>, transform_indices = @transform_5, window_bounds = array<i64: 4, 32>}, {pipeline_mode = #tpu.pipeline_mode<synchronous>, transform_indices = @transform_6, window_bounds = array<i64: 4, 1>}, {transform_indices = @transform_7, window_bounds = array<i64: 4, 4>}]} {
    %c0 = arith.constant 0 : index
    %c0_0 = arith.constant 0 : index
    %0 = vector.load %arg1[%c0, %c0_0] : memref<8x4xf32, #tpu.memory_space<vmem>>, vector<8x4xf32>
    %c0_1 = arith.constant 0 : index
    %c0_2 = arith.constant 0 : index
    %1 = vector.load %arg2[%c0_1, %c0_2] : memref<32x8xf32, #tpu.memory_space<vmem>>, vector<32x8xf32>
    %cst = arith.constant dense<0.000000e+00> : vector<32x4xf32>
    %2 = tpu.matmul %1, %0, %cst {dimension_numbers = #tpu.dot_dimension_numbers<[1], [0], [0], [1], [0, 0, 1, 1], [], []>} : vector<32x8xf32>, vector<8x4xf32>, vector<32x4xf32> -> vector<32x4xf32>
    %c0_3 = arith.constant 0 : index
    %c0_4 = arith.constant 0 : index
    %3 = vector.load %arg3[%c0_3, %c0_4] : memref<32x1xf32, #tpu.memory_space<vmem>>, vector<32x1xf32>
    %4 = vector.broadcast %3 : vector<32x1xf32> to vector<32x4xf32>
    %5 = arith.addf %2, %4 : vector<32x4xf32>
    %cst_5 = arith.constant 0.000000e+00 : f32
    %6 = vector.broadcast %cst_5 : f32 to vector<32x4xf32>
    %7 = arith.cmpf ogt, %5, %6 : vector<32x4xf32>
    %cst_6 = arith.constant 0.00999999977 : f32
    %8 = vector.broadcast %cst_6 : f32 to vector<32x4xf32>
    %9 = arith.mulf %8, %5 : vector<32x4xf32>
    %10 = arith.select %7, %5, %9 : vector<32x4xi1>, vector<32x4xf32>
    %c0_7 = arith.constant 0 : index
    %c0_8 = arith.constant 0 : index
    %11 = vector.load %arg4[%c0_7, %c0_8] : memref<32x32xf32, #tpu.memory_space<vmem>>, vector<32x32xf32>
    %cst_9 = arith.constant dense<0.000000e+00> : vector<32x4xf32>
    %12 = tpu.matmul %11, %10, %cst_9 {dimension_numbers = #tpu.dot_dimension_numbers<[1], [0], [0], [1], [0, 0, 1, 1], [], []>} : vector<32x32xf32>, vector<32x4xf32>, vector<32x4xf32> -> vector<32x4xf32>
    %c0_10 = arith.constant 0 : index
    %c0_11 = arith.constant 0 : index
    %13 = vector.load %arg5[%c0_10, %c0_11] : memref<32x1xf32, #tpu.memory_space<vmem>>, vector<32x1xf32>
    %14 = vector.broadcast %13 : vector<32x1xf32> to vector<32x4xf32>
    %15 = arith.addf %12, %14 : vector<32x4xf32>
    %cst_12 = arith.constant 0.000000e+00 : f32
    %16 = vector.broadcast %cst_12 : f32 to vector<32x4xf32>
    %17 = arith.cmpf ogt, %15, %16 : vector<32x4xf32>
    %cst_13 = arith.constant 0.00999999977 : f32
    %18 = vector.broadcast %cst_13 : f32 to vector<32x4xf32>
    %19 = arith.mulf %18, %15 : vector<32x4xf32>
    %20 = arith.select %17, %15, %19 : vector<32x4xi1>, vector<32x4xf32>
    %c0_14 = arith.constant 0 : index
    %c0_15 = arith.constant 0 : index
    %21 = vector.load %arg6[%c0_14, %c0_15] : memref<4x32xf32, #tpu.memory_space<vmem>>, vector<4x32xf32>
    %cst_16 = arith.constant dense<0.000000e+00> : vector<4x4xf32>
    %22 = tpu.matmul %21, %20, %cst_16 {dimension_numbers = #tpu.dot_dimension_numbers<[1], [0], [0], [1], [0, 0, 1, 1], [], []>} : vector<4x32xf32>, vector<32x4xf32>, vector<4x4xf32> -> vector<4x4xf32>
    %c0_17 = arith.constant 0 : index
    %c0_18 = arith.constant 0 : index
    %23 = vector.load %arg7[%c0_17, %c0_18] : memref<4x1xf32, #tpu.memory_space<vmem>>, vector<4x1xf32>
    %24 = vector.broadcast %23 : vector<4x1xf32> to vector<4x4xf32>
    %25 = arith.addf %22, %24 : vector<4x4xf32>
    %cst_19 = arith.constant dense<0xFF800000> : vector<4xf32>
    %26 = vector.multi_reduction <maximumf>, %25, %cst_19 [0] : vector<4x4xf32> to vector<4xf32>
    %27 = vector.shape_cast %26 : vector<4xf32> to vector<1x4xf32>
    %28 = vector.broadcast %27 : vector<1x4xf32> to vector<4x4xf32>
    %29 = arith.subf %25, %28 : vector<4x4xf32>
    %30 = math.exp %29 : vector<4x4xf32>
    %cst_20 = arith.constant dense<0.000000e+00> : vector<4xf32>
    %31 = vector.multi_reduction <add>, %30, %cst_20 [0] : vector<4x4xf32> to vector<4xf32>
    %32 = vector.shape_cast %31 : vector<4xf32> to vector<1x4xf32>
    %33 = vector.broadcast %32 : vector<1x4xf32> to vector<4x4xf32>
    %34 = arith.divf %30, %33 : vector<4x4xf32>
    %c0_21 = arith.constant 0 : index
    %c0_22 = arith.constant 0 : index
    %35 = vector.load %arg8[%c0_21, %c0_22] : memref<4x4xf32, #tpu.memory_space<vmem>>, vector<4x4xf32>
    tpu.vector_store %arg8[%c0_21, %c0_22], %34 {strides = array<i32>} : memref<4x4xf32, #tpu.memory_space<vmem>>, vector<4x4xf32>,
    return
  }
  func.func @transform_0(%arg0: i32) -> (i32, i32) {
    %c0_i32 = arith.constant 0 : i32
    %c0_i32_0 = arith.constant 0 : i32
    return %c0_i32, %arg0 : i32, i32
  }
  func.func @transform_1(%arg0: i32) -> (i32, i32) {
    %c0_i32 = arith.constant 0 : i32
    %c0_i32_0 = arith.constant 0 : i32
    %c0_i32_1 = arith.constant 0 : i32
    return %c0_i32, %c0_i32_0 : i32, i32
  }
  func.func @transform_2(%arg0: i32) -> (i32, i32) {
    %c0_i32 = arith.constant 0 : i32
    %c0_i32_0 = arith.constant 0 : i32
    %c0_i32_1 = arith.constant 0 : i32
    return %c0_i32, %c0_i32_0 : i32, i32
  }
  func.func @transform_3(%arg0: i32) -> (i32, i32) {
    %c0_i32 = arith.constant 0 : i32
    %c0_i32_0 = arith.constant 0 : i32
    %c0_i32_1 = arith.constant 0 : i32
    return %c0_i32, %c0_i32_0 : i32, i32
  }
  func.func @transform_4(%arg0: i32) -> (i32, i32) {
    %c0_i32 = arith.constant 0 : i32
    %c0_i32_0 = arith.constant 0 : i32
    %c0_i32_1 = arith.constant 0 : i32
    return %c0_i32, %c0_i32_0 : i32, i32
  }
  func.func @transform_5(%arg0: i32) -> (i32, i32) {
    %c0_i32 = arith.constant 0 : i32
    %c0_i32_0 = arith.constant 0 : i32
    %c0_i32_1 = arith.constant 0 : i32
    return %c0_i32, %c0_i32_0 : i32, i32
  }
  func.func @transform_6(%arg0: i32) -> (i32, i32) {
    %c0_i32 = arith.constant 0 : i32
    %c0_i32_0 = arith.constant 0 : i32
    %c0_i32_1 = arith.constant 0 : i32
    return %c0_i32, %c0_i32_0 : i32, i32
  }
  func.func @transform_7(%arg0: i32) -> (i32, i32) {
    %c0_i32 = arith.constant 0 : i32
    %c0_i32_0 = arith.constant 0 : i32
    return %c0_i32, %arg0 : i32, i32
  }
}

</mosaic_0001>

<bundles_post_ra>
// kernel: nn_pi_forward.1
= control target key start
LH: loop header
LB: loop body
LE: loop exit
PB: predicated region body
PF: predicated region fallthrough
CT: control target
= control target key end

     0   :  { %vm55_vm0 = vcmask 64512   ;;  %v492_v3 = vmov 0   ;;  %vm193_vm1 = vcmask 261120   ;;  %v493_v41 = vmov 0.0|0.0   ;;  %s608_s0 = inlined_call_operand.vmem [shape: f32[8,4], index: 0, kind: input, shape index: {}]   ;;  %s609_s1 = inlined_call_operand.vmem [shape: f32[32,8], index: 1, kind: input, shape index: {}]   ;;  %s610_s2 = inlined_call_operand.vmem [shape: f32[32,1], index: 2, kind: input, shape index: {}]   ;;  %s611_s4 = inlined_call_operand.vmem [shape: f32[32,1], index: 4, kind: input, shape index: {}]   ;;  %s612_s6 = inlined_call_operand.vmem [shape: f32[4,1], index: 6, kind: input, shape index: {}]   ;;  %s613_s3 = inlined_call_operand.vmem [shape: f32[32,32], index: 3, kind: input, shape index: {}]   ;;  %s614_s5 = inlined_call_operand.vmem [shape: f32[4,32], index: 5, kind: input, shape index: {}]   ;;  %s615_s7 = inlined_call_operand.vmem [shape: f32[4,4], index: 7, kind: output, shape index: {}]  }
   0x1   :  { %v26_v0 = vld [vmem:[%s608_s0] sm:$0xff]  ;;  %v28_v2 = vld [vmem:[%s609_s1 + $0x8] sm:$0xff]  ;;  %486 = vset.pattern.permute.xlu0 %v492_v3  ;;  %487 = vset.pattern.permute.xlu1 %v492_v3  ;;  %v29_v4 = vld [vmem:[%s609_s1 + $0x10] sm:$0xff]  ;;  %vm494_vm6 = vmmov 0   ;;  %v495_v42 = vmov 0.0   ;;  %vm383_vm11 = vcmask 27648  }
   0x2   :  { %v27_v1 = vld [vmem:[%s609_s1] sm:$0xff]  ;;  %435 = vmatprep.subr.mxu0 %v26_v0  ;;  %v33_v6 = vld [vmem:[%s610_s2 + $0x10] sm:$0xff]  ;;  %v32_v7 = vld [vmem:[%s610_s2 + $0x8] sm:$0xff] }
   0x3   :  { %437 = vmatprep.mubr.msk.f32.mxu0 %vm55_vm0, %v27_v1  ;;  %v31_v5 = vld [vmem:[%s610_s2] sm:$0xff]  ;;  %436 = vmatpush3.msra.mxu0 %v26_v0  ;;  %v30_v8 = vld [vmem:[%s609_s1 + $0x18] sm:$0xff]  ;;  %v170_v11 = vld [vmem:[%s611_s4 + $0x8] sm:$0xff] }
   0x4   :  { %37 = vperm.xlu0 %486, %v31_v5   ;;  %438 = vmatmul.mubr.msk.f32.vlgmr.msra.gmra.mrb[0].mxu0 %vm55_vm0, %v28_v2  ;;  %v34_v9 = vld [vmem:[%s610_s2 + $0x18] sm:$0xff]  ;;  %v169_v10 = vld [vmem:[%s611_s4] sm:$0xff]  ;;  %v171_v12 = vld [vmem:[%s611_s4 + $0x10] sm:$0xff] }
   0x5   :  { %47 = vperm.xlu1 %487, %v33_v6   ;;  %440 = vmatprep.mubr.msk.f32.mxu0 %vm55_vm0, %v29_v4  ;;  %v172_v13 = vld [vmem:[%s611_s4 + $0x18] sm:$0xff]  ;;  %v304_v14 = vld [vmem:[%s612_s6] sm:$0xf]  ;;  %v166_v38 = vld [vmem:[%s613_s3 + $0x8] sm:$0xff] }
   0x6   :  { %v165_v15 = vld [vmem:[%s613_s3] sm:$0xff]  ;;  %v167_v39 = vld [vmem:[%s613_s3 + $0x10] sm:$0xff]  ;;  %v168_v40 = vld [vmem:[%s613_s3 + $0x18] sm:$0xff]  ;;  %476 = vmatprep.subr.bf16.mxu0 %v493_v41 }
   0x7   :  { %451 = vmatprep.mubr.msk.f32.mxu1 %vm193_vm1, %v165_v15  ;;  %v303_v1 = vld [vmem:[%s614_s5] sm:$0xf] }
   0x8   :  { %42 = vperm.xlu0 %486, %v32_v7   ;;  %441 = vmatmul.mubr.msk.f32.gmra.mrb[2].mxu0 %vm55_vm0, %v30_v8 }
   0x9   :  { %52 = vperm.xlu1 %487, %v34_v9   ;;  %465 = vmatprep.mubr.msk.f32.mxu0 %vm494_vm6, %v495_v42 }
   0xc   :  { %175 = vperm.xlu0 %486, %v169_v10  }
   0xd   :  { %180 = vperm.xlu1 %487, %v170_v11  }
  0x10   :  { %185 = vperm.xlu0 %486, %v171_v12  }
  0x11   :  { %190 = vperm.xlu1 %487, %v172_v13  }
  0x14   :  { %307 = vperm.xlu0 %486, %v304_v14  }
  0x83   :  { %v38_v16 = vpop.permute.xlu0 %37 }
  0x84   :  { %v48_v17 = vpop.permute.xlu1 %47 }
  0x87   :  { %v43_v18 = vpop.permute.xlu0 %42 }
  0x88   :  { %v53_v24 = vpop.permute.xlu1 %52 }
  0x8b   :  { %v176_v44 = vpop.permute.xlu0 %175 }
  0x8c   :  { %v181_v43 = vpop.permute.xlu1 %180 }
  0x8f   :  { %v186_v53 = vpop.permute.xlu0 %185 }
  0x90   :  { %v191_v50 = vpop.permute.xlu1 %190 }
  0x93   :  { %v308_v2 = vpop.permute.xlu0 %307 }
  0xd7   :  { %v439_v19 = vpop.f32.mrb[0].mxu0 }
  0xd8   :  { %v140_v20 = vadd.f32 %v439_v19, %v43_v18  ;;  %v134_v21 = vpop.f32.mrb[1].mxu0 }
  0xd9   :  { %v135_v22 = vadd.f32 %v134_v21, %v38_v16 }
  0xda   :  { %v158_v23 = vmul.f32 0.01, %v140_v20  ;;  %vm154_vm2 = vcmp.gt.f32.partialorder %v140_v20, 0.0 }
  0xdb   :  { %v157_v25 = vmul.f32 0.01, %v135_v22  ;;  %v442_v26 = vpop.f32.mrb[2].mxu0  ;;  %vm153_vm3 = vcmp.gt.f32.partialorder %v135_v22, 0.0 }
  0xdc   :  { %v150_v27 = vadd.f32 %v442_v26, %v53_v24  ;;  %v144_v28 = vpop.f32.mrb[3].mxu0  ;;  %v162_v29 = vsel %vm154_vm2, %v140_v20, %v158_v23 }
  0xdd   :  { %v145_v30 = vadd.f32 %v144_v28, %v48_v17  ;;  %v161_v31 = vsel %vm153_vm3, %v135_v22, %v157_v25 }
  0xde   :  { %vm156_vm4 = vcmp.gt.f32.partialorder %v150_v27, 0.0  ;;  %v160_v32 = vmul.f32 0.01, %v150_v27  ;;  %v468_v33 = vpack.c.bf16 %v162_v29, %v161_v31 }
  0xdf   :  { %vm155_vm5 = vcmp.gt.f32.partialorder %v145_v30, 0.0  ;;  %v159_v34 = vmul.f32 0.01, %v145_v30 }
  0xe0   :  { %469 = vmatprep.subr.bf16.mxu1 %v468_v33  ;;  %v164_v35 = vsel %vm156_vm4, %v150_v27, %v160_v32 }
  0xe1   :  { %471 = vmatpush3.bf16.msra.mxu1 %v468_v33  ;;  %v163_v36 = vsel %vm155_vm5, %v145_v30, %v159_v34 }
  0xe2   :  { %v472_v37 = vpack.c.bf16 %v164_v35, %v163_v36 }
  0xe4   :  { %473 = vmatprep.subr.bf16.mxu1 %v472_v37 }
  0xe5   :  { %475 = vmatpush3.bf16.msra.mxu1 %v472_v37 }
  0xe8   :  { %452 = vmatmul.mubr.msk.f32.vlgmr.msra.gmra.mrb[0].mxu1 %vm193_vm1, %v166_v38 }
  0xe9   :  { %454 = vmatprep.mubr.msk.f32.mxu1 %vm193_vm1, %v167_v39 }
  0xec   :  { %455 = vmatmul.mubr.msk.f32.gmra.mrb[2].mxu1 %vm193_vm1, %v168_v40 }
 0x1bb   :  { %v453_v45 = vpop.f32.mrb[0].mxu1 }
 0x1bc   :  { %v278_v46 = vadd.f32 %v453_v45, %v181_v43  ;;  %v272_v47 = vpop.f32.mrb[1].mxu1 }
 0x1bd   :  { %v273_v48 = vadd.f32 %v272_v47, %v176_v44 }
 0x1be   :  { %vm292_vm7 = vcmp.gt.f32.partialorder %v278_v46, 0.0  ;;  %v296_v49 = vmul.f32 0.01, %v278_v46 }
 0x1bf   :  { %vm291_vm8 = vcmp.gt.f32.partialorder %v273_v48, 0.0  ;;  %v295_v51 = vmul.f32 0.01, %v273_v48  ;;  %v456_v52 = vpop.f32.mrb[2].mxu1 }
 0x1c0   :  { %v300_v54 = vsel %vm292_vm7, %v278_v46, %v296_v49  ;;  %v288_v55 = vadd.f32 %v456_v52, %v191_v50  ;;  %v282_v56 = vpop.f32.mrb[3].mxu1 }
 0x1c1   :  { %v299_v57 = vsel %vm291_vm8, %v273_v48, %v295_v51  ;;  %v283_v58 = vadd.f32 %v282_v56, %v186_v53 }
 0x1c2   :  { %v477_v59 = vpack.c.bf16 %v300_v54, %v299_v57  ;;  %vm294_vm9 = vcmp.gt.f32.partialorder %v288_v55, 0.0  ;;  %v298_v60 = vmul.f32 0.01, %v288_v55 }
 0x1c3   :  { %vm293_vm10 = vcmp.gt.f32.partialorder %v283_v58, 0.0  ;;  %v297_v61 = vmul.f32 0.01, %v283_v58 }
 0x1c4   :  { %v302_v62 = vsel %vm294_vm9, %v288_v55, %v298_v60  ;;  %478 = vmatpush3.bf16.msra.mxu0 %v477_v59 }
 0x1c5   :  { %v301_v63 = vsel %vm293_vm10, %v283_v58, %v297_v61  ;;  %479 = vmatprep.subr.bf16.mxu0 %v493_v41 }
 0x1c6   :  { %v480_v0 = vpack.c.bf16 %v302_v62, %v301_v63 }
 0x1c8   :  { %481 = vmatpush3.bf16.msra.mxu0 %v480_v0 }
 0x1cb   :  { %466 = vmatmul.mubr.msk.f32.vlgmr.msra.gmra.mrb[4].mxu0 %vm193_vm1, %v303_v1 }
 0x29e   :  { %v379_v3 = vpop.f32.mrb[4].mxu0 }
 0x29f   :  { %v380_v4 = vadd.f32 %v379_v3, %v308_v2  ;;  %v467_v5 = vpop.f32.mrb[5].mxu0 }
 0x2a1   :  { %v384_v6 = vsel %vm383_vm11, %v380_v4, -inf }
 0x2a2   :  { %v385_v7 = vrot.slane %v384_v6, 4 }
 0x2a4   :  { %v386_v8 = vmax.f32 %v384_v6, %v385_v7 }
 0x2a6   :  { %v387_v9 = vrot.slane %v386_v8, 2 }
 0x2a8   :  { %v388_v10 = vmax.f32 %v386_v8, %v387_v9 }
 0x2aa   :  { %v389_v11 = vrot.slane %v388_v10, 1 }
 0x2ac   :  { %v390_v12 = vmax.f32 %v388_v10, %v389_v11 }
 0x2ae   :  { %v391_v13 = vsub.f32 %v380_v4, %v390_v12 }
 0x2b0   :  { %v392_v14 = vmul.f32 1.442695, %v391_v13 }
 0x2b2   :  { %488 = vpow2.f32 %v392_v14 }
 0x2bc   :  { %v489_v15 = vpop.eup %488 }
 0x2bd   :  { %v394_v16 = vsel %vm383_vm11, %v489_v15, 0.0 }
 0x2be   :  { %v395_v17 = vrot.slane %v394_v16, 4 }
 0x2c0   :  { %v396_v18 = vadd.f32 %v395_v17, %v394_v16 }
 0x2c2   :  { %v397_v19 = vrot.slane %v396_v18, 2 }
 0x2c4   :  { %v398_v20 = vadd.f32 %v397_v19, %v396_v18 }
 0x2c6   :  { %v399_v21 = vrot.slane %v398_v20, 1 }
 0x2c8   :  { %v400_v22 = vadd.f32 %v399_v21, %v398_v20 }
 0x2ca   :  { %490 = vrcp.f32 %v400_v22 }
 0x2d4   :  { %v491_v23 = vpop.eup %490 }
 0x2d5   :  { %v402_v24 = vmul.f32 %v491_v23, %v489_v15 }
 0x2d7   :  { %403 = vst.msk [vmem:[%s615_s7] sm:$0xf] %vm383_vm11, %v402_v24 }

</bundles_post_ra>
